<compile_context>
chip_gen: v5e
topology: v5e:2x2
jax: 0.10.0
libtpu: 0.0.40
codegen_flags: <defaults>
</compile_context>

<pallas_src>
import math
from functools import partial

import jax
import jax.numpy as jnp
from jax import lax
from jax.experimental import pallas as pl
from jax.experimental.pallas import tpu as pltpu


def _conv2d_same_kernel(x_ref, w_ref, m_ref, b_ref, o_ref, *, W, KH, KW, pad):
    """One batch element of a stride-1 'same' conv, NCHW with flat spatial.

    x_ref: (1, Cin,  H*W)       input,  lane axis = flat spatial (lane-dense)
    w_ref: (KH*KW, Cout, Cin)   weights, one (Cout, Cin) slab per tap
    m_ref: (KH*KW, 1, H*W)      per-tap 0/1 padding masks
    b_ref: (Cout, 1)            bias
    o_ref: (1, Cout, H*W)       output, lane axis = flat spatial (lane-dense)
    """
    HW = x_ref.shape[2]
    Cout = o_ref.shape[1]

    x = x_ref[0]                                   # (Cin, HW) single full-tile load

    acc = jnp.zeros((Cout, HW), jnp.float32)       # 2 vregs -> lives in registers
    for kh in range(KH):
        for kw in range(KW):
            s = (kh - pad) * W + (kw - pad)        # flat source offset of this tap
            if s == 0:
                shifted = x
            else:
                # XLU rotate along lanes: shifted[ci, p] = x[ci, (p + s) % HW]
                shifted = pltpu.roll(x, (-s) % HW, axis=1)
            # Mask out zero-padding positions (also covers roll wrap-around,
            # which only happens at positions that are masked anyway).
            xs = shifted * m_ref[kh * KW + kw]     # (Cin, HW) * (1, HW)
            # Contract Cin on the MXU: (Cout, Cin) x (Cin, HW) -> (Cout, HW).
            acc = acc + lax.dot_general(
                w_ref[kh * KW + kw], xs,
                dimension_numbers=(((1,), (0,)), ((), ())),
                preferred_element_type=jnp.float32)

    acc = acc + b_ref[...]                         # (Cout, 1) lane-broadcast add
    o_ref[0] = acc.astype(o_ref.dtype)


def branch_conv_forward(i, x_nchw, weight_oihw, bias, *, stride=1, padding=1,
                        dilation=1, groups=1):
    """branch_conv.forward(i, x) for the part_deform=False path.

    `i` is ignored on this path (the PyTorch module only consults it when
    part_deform=True).
    """
    del i
    # TODO(synk): stride>1, dilation>1, groups>1 and the deformable (dcn_v2)
    # branch (part_deform=True, i >= level) are not implemented.
    assert stride == 1 and dilation == 1 and groups == 1

    N, Cin, H, W = x_nchw.shape
    Cout, Cin_w, KH, KW = weight_oihw.shape
    assert Cin_w == Cin

    Ho = H + 2 * padding - KH + 1
    Wo = W + 2 * padding - KW + 1
    # TODO(synk): only the 'same'-size output case (2*padding == K-1) is
    # supported by the flat-spatial roll formulation below.
    assert (Ho, Wo) == (H, W)

    HW = H * W

    # Layout glue is limited to free contiguous reshapes of the activations
    # and a 288-element weight transpose; no jnp.pad, no NHWC round-trip.
    x_flat = x_nchw.reshape(N, Cin, HW)
    w_taps = jnp.transpose(weight_oihw, (2, 3, 0, 1)).reshape(KH * KW, Cout, Cin)
    b2d = bias.reshape(Cout, 1)

    # Precompute per-tap 0/1 padding masks (tiny: KH*KW x H*W) so the kernel
    # needs no integer div/mod or iota work per grid step.
    r = jnp.arange(H)
    c = jnp.arange(W)
    mask_list = []
    for kh in range(KH):
        for kw in range(KW):
            dh, dw = kh - padding, kw - padding
            mrow = (r + dh >= 0) & (r + dh < H)            # (H,)
            mcol = (c + dw >= 0) & (c + dw < W)            # (W,)
            m = mrow[:, None] & mcol[None, :]              # (H, W)
            mask_list.append(m.reshape(1, HW))
    masks = jnp.stack(mask_list).astype(x_nchw.dtype)      # (KH*KW, 1, HW)

    kernel = partial(_conv2d_same_kernel, W=W, KH=KH, KW=KW, pad=padding)

    out_flat = pl.pallas_call(
        kernel,
        out_shape=jax.ShapeDtypeStruct((N, Cout, HW), x_nchw.dtype),
        grid_spec=pltpu.PrefetchScalarGridSpec(
            num_scalar_prefetch=0,
            grid=(N,),
            in_specs=[
                # per-batch activation tile, flat spatial on lanes (lane-dense)
                pl.BlockSpec((1, Cin, HW), lambda n: (n, 0, 0)),
                # weights / masks / bias: constant block index -> fetched once,
                # kept resident across the grid.
                pl.BlockSpec((KH * KW, Cout, Cin), lambda n: (0, 0, 0)),
                pl.BlockSpec((KH * KW, 1, HW), lambda n: (0, 0, 0)),
                pl.BlockSpec((Cout, 1), lambda n: (0, 0)),
            ],
            out_specs=pl.BlockSpec((1, Cout, HW), lambda n: (n, 0, 0)),
        ),
        compiler_params=pltpu.CompilerParams(
            dimension_semantics=("parallel",),
            vmem_limit_bytes=32 * 1024 * 1024,
        ),
    )(x_flat, w_taps, masks, b2d)

    # TODO(synk): for production spatial sizes, add an Ho-tile grid axis
    # ("parallel") with a (KH-1)-row halo and a VMEM scratch accumulator so
    # blocks fit v7x's 64 MiB VMEM; at 16x16 one spatial tile per batch
    # element is already optimal.
    return out_flat.reshape(N, Cout, Ho, Wo)   # free reshape back to NCHW


if __name__ == "__main__":
    # module config: in_channels=4, out_channels=8, kernel_size=3, padding=1
    in_channels, out_channels, ksize, padding = 4, 8, 3, 1
    N, H, W = 2, 16, 16

    key = jax.random.PRNGKey(0)
    kx, kweight = jax.random.split(key)

    x = jax.random.normal(kx, (N, in_channels, H, W), dtype=jnp.float32)

    # reset_parameters(): uniform(-stdv, stdv), stdv = 1/sqrt(Cin*KH*KW)
    stdv = 1.0 / math.sqrt(in_channels * ksize * ksize)
    weight = jax.random.uniform(
        kweight, (out_channels, in_channels, ksize, ksize),
        minval=-stdv, maxval=stdv, dtype=jnp.float32)
    # self.bias = nn.Parameter(torch.zeros(out_channels))
    bias = jnp.zeros((out_channels,), jnp.float32)

    out = branch_conv_forward(0, x, weight, bias, padding=padding)
    out = jax.block_until_ready(out)

    # reference: same semantics as F.conv2d(x, weight, bias, stride=1, padding=1)
    ref = lax.conv_general_dilated(
        x, weight, window_strides=(1, 1), padding=[(padding, padding)] * 2,
        dimension_numbers=("NCHW", "OIHW", "NCHW"))
    ref = ref + bias[None, :, None, None]
    assert out.shape == ref.shape
    assert jnp.allclose(out, ref, atol=1e-5, rtol=1e-5)

    print("KERNEL_OK")
</pallas_src>

<mosaic_0001>
module attributes {stable_mosaic.version = 11 : i64} {
  func.func @_conv2d_same_kernel(%arg0: i32, %arg1: memref<1x4x256xf32, #tpu.memory_space<vmem>>, %arg2: memref<9x8x4xf32, #tpu.memory_space<vmem>>, %arg3: memref<9x1x256xf32, #tpu.memory_space<vmem>>, %arg4: memref<8x1xf32, #tpu.memory_space<vmem>>, %arg5: memref<1x8x256xf32, #tpu.memory_space<vmem>>) attributes {dimension_semantics = [#tpu.dimension_semantics<parallel>], iteration_bounds = array<i64: 2>, scalar_prefetch = 0 : i64, scratch_operands = 0 : i64, tpu.core_type = #tpu.core_type<tc>, window_params = [{transform_indices = @transform_0, window_bounds = array<i64: 1, 4, 256>}, {pipeline_mode = #tpu.pipeline_mode<synchronous>, transform_indices = @transform_1, window_bounds = array<i64: 9, 8, 4>}, {pipeline_mode = #tpu.pipeline_mode<synchronous>, transform_indices = @transform_2, window_bounds = array<i64: 9, 1, 256>}, {pipeline_mode = #tpu.pipeline_mode<synchronous>, transform_indices = @transform_3, window_bounds = array<i64: 8, 1>}, {transform_indices = @transform_4, window_bounds = array<i64: 1, 8, 256>}]} {
    %c0 = arith.constant 0 : index
    %c0_0 = arith.constant 0 : index
    %c0_1 = arith.constant 0 : index
    %0 = vector.load %arg1[%c0, %c0_0, %c0_1] : memref<1x4x256xf32, #tpu.memory_space<vmem>>, vector<1x4x256xf32>
    %1 = vector.shape_cast %0 : vector<1x4x256xf32> to vector<4x256xf32>
    %cst = arith.constant 0.000000e+00 : f32
    %2 = vector.broadcast %cst : f32 to vector<8x256xf32>
    %c17_i32 = arith.constant 17 : i32
    %3 = tpu.dynamic_rotate %1 by %c17_i32 dim 1 : vector<4x256xf32>, i32 -> vector<4x256xf32>
    %c0_2 = arith.constant 0 : index
    %c0_3 = arith.constant 0 : index
    %c0_4 = arith.constant 0 : index
    %4 = vector.load %arg3[%c0_2, %c0_3, %c0_4] : memref<9x1x256xf32, #tpu.memory_space<vmem>>, vector<1x1x256xf32>
    %5 = vector.shape_cast %4 : vector<1x1x256xf32> to vector<1x256xf32>
    %6 = vector.broadcast %5 : vector<1x256xf32> to vector<4x256xf32>
    %7 = arith.mulf %3, %6 : vector<4x256xf32>
    %c0_5 = arith.constant 0 : index
    %c0_6 = arith.constant 0 : index
    %c0_7 = arith.constant 0 : index
    %8 = vector.load %arg2[%c0_5, %c0_6, %c0_7] : memref<9x8x4xf32, #tpu.memory_space<vmem>>, vector<1x8x4xf32>
    %9 = vector.shape_cast %8 : vector<1x8x4xf32> to vector<8x4xf32>
    %cst_8 = arith.constant dense<0.000000e+00> : vector<8x256xf32>
    %10 = tpu.matmul %9, %7, %cst_8 {dimension_numbers = #tpu.dot_dimension_numbers<[1], [0], [0], [1], [0, 0, 1, 1], [], []>} : vector<8x4xf32>, vector<4x256xf32>, vector<8x256xf32> -> vector<8x256xf32>
    %11 = arith.addf %2, %10 : vector<8x256xf32>
    %c16_i32 = arith.constant 16 : i32
    %12 = tpu.dynamic_rotate %1 by %c16_i32 dim 1 : vector<4x256xf32>, i32 -> vector<4x256xf32>
    %c1 = arith.constant 1 : index
    %c0_9 = arith.constant 0 : index
    %c0_10 = arith.constant 0 : index
    %13 = vector.load %arg3[%c1, %c0_9, %c0_10] : memref<9x1x256xf32, #tpu.memory_space<vmem>>, vector<1x1x256xf32>
    %14 = vector.shape_cast %13 : vector<1x1x256xf32> to vector<1x256xf32>
    %15 = vector.broadcast %14 : vector<1x256xf32> to vector<4x256xf32>
    %16 = arith.mulf %12, %15 : vector<4x256xf32>
    %c1_11 = arith.constant 1 : index
    %c0_12 = arith.constant 0 : index
    %c0_13 = arith.constant 0 : index
    %17 = vector.load %arg2[%c1_11, %c0_12, %c0_13] : memref<9x8x4xf32, #tpu.memory_space<vmem>>, vector<1x8x4xf32>
    %18 = vector.shape_cast %17 : vector<1x8x4xf32> to vector<8x4xf32>
    %cst_14 = arith.constant dense<0.000000e+00> : vector<8x256xf32>
    %19 = tpu.matmul %18, %16, %cst_14 {dimension_numbers = #tpu.dot_dimension_numbers<[1], [0], [0], [1], [0, 0, 1, 1], [], []>} : vector<8x4xf32>, vector<4x256xf32>, vector<8x256xf32> -> vector<8x256xf32>
    %20 = arith.addf %11, %19 : vector<8x256xf32>
    %c15_i32 = arith.constant 15 : i32
    %21 = tpu.dynamic_rotate %1 by %c15_i32 dim 1 : vector<4x256xf32>, i32 -> vector<4x256xf32>
    %c2 = arith.constant 2 : index
    %c0_15 = arith.constant 0 : index
    %c0_16 = arith.constant 0 : index
    %22 = vector.load %arg3[%c2, %c0_15, %c0_16] : memref<9x1x256xf32, #tpu.memory_space<vmem>>, vector<1x1x256xf32>
    %23 = vector.shape_cast %22 : vector<1x1x256xf32> to vector<1x256xf32>
    %24 = vector.broadcast %23 : vector<1x256xf32> to vector<4x256xf32>
    %25 = arith.mulf %21, %24 : vector<4x256xf32>
    %c2_17 = arith.constant 2 : index
    %c0_18 = arith.constant 0 : index
    %c0_19 = arith.constant 0 : index
    %26 = vector.load %arg2[%c2_17, %c0_18, %c0_19] : memref<9x8x4xf32, #tpu.memory_space<vmem>>, vector<1x8x4xf32>
    %27 = vector.shape_cast %26 : vector<1x8x4xf32> to vector<8x4xf32>
    %cst_20 = arith.constant dense<0.000000e+00> : vector<8x256xf32>
    %28 = tpu.matmul %27, %25, %cst_20 {dimension_numbers = #tpu.dot_dimension_numbers<[1], [0], [0], [1], [0, 0, 1, 1], [], []>} : vector<8x4xf32>, vector<4x256xf32>, vector<8x256xf32> -> vector<8x256xf32>
    %29 = arith.addf %20, %28 : vector<8x256xf32>
    %c1_i32 = arith.constant 1 : i32
    %30 = tpu.dynamic_rotate %1 by %c1_i32 dim 1 : vector<4x256xf32>, i32 -> vector<4x256xf32>
    %c3 = arith.constant 3 : index
    %c0_21 = arith.constant 0 : index
    %c0_22 = arith.constant 0 : index
    %31 = vector.load %arg3[%c3, %c0_21, %c0_22] : memref<9x1x256xf32, #tpu.memory_space<vmem>>, vector<1x1x256xf32>
    %32 = vector.shape_cast %31 : vector<1x1x256xf32> to vector<1x256xf32>
    %33 = vector.broadcast %32 : vector<1x256xf32> to vector<4x256xf32>
    %34 = arith.mulf %30, %33 : vector<4x256xf32>
    %c3_23 = arith.constant 3 : index
    %c0_24 = arith.constant 0 : index
    %c0_25 = arith.constant 0 : index
    %35 = vector.load %arg2[%c3_23, %c0_24, %c0_25] : memref<9x8x4xf32, #tpu.memory_space<vmem>>, vector<1x8x4xf32>
    %36 = vector.shape_cast %35 : vector<1x8x4xf32> to vector<8x4xf32>
    %cst_26 = arith.constant dense<0.000000e+00> : vector<8x256xf32>
    %37 = tpu.matmul %36, %34, %cst_26 {dimension_numbers = #tpu.dot_dimension_numbers<[1], [0], [0], [1], [0, 0, 1, 1], [], []>} : vector<8x4xf32>, vector<4x256xf32>, vector<8x256xf32> -> vector<8x256xf32>
    %38 = arith.addf %29, %37 : vector<8x256xf32>
    %c4 = arith.constant 4 : index
    %c0_27 = arith.constant 0 : index
    %c0_28 = arith.constant 0 : index
    %39 = vector.load %arg3[%c4, %c0_27, %c0_28] : memref<9x1x256xf32, #tpu.memory_space<vmem>>, vector<1x1x256xf32>
    %40 = vector.shape_cast %39 : vector<1x1x256xf32> to vector<1x256xf32>
    %41 = vector.broadcast %40 : vector<1x256xf32> to vector<4x256xf32>
    %42 = arith.mulf %1, %41 : vector<4x256xf32>
    %c4_29 = arith.constant 4 : index
    %c0_30 = arith.constant 0 : index
    %c0_31 = arith.constant 0 : index
    %43 = vector.load %arg2[%c4_29, %c0_30, %c0_31] : memref<9x8x4xf32, #tpu.memory_space<vmem>>, vector<1x8x4xf32>
    %44 = vector.shape_cast %43 : vector<1x8x4xf32> to vector<8x4xf32>
    %cst_32 = arith.constant dense<0.000000e+00> : vector<8x256xf32>
    %45 = tpu.matmul %44, %42, %cst_32 {dimension_numbers = #tpu.dot_dimension_numbers<[1], [0], [0], [1], [0, 0, 1, 1], [], []>} : vector<8x4xf32>, vector<4x256xf32>, vector<8x256xf32> -> vector<8x256xf32>
    %46 = arith.addf %38, %45 : vector<8x256xf32>
    %c255_i32 = arith.constant 255 : i32
    %47 = tpu.dynamic_rotate %1 by %c255_i32 dim 1 : vector<4x256xf32>, i32 -> vector<4x256xf32>
    %c5 = arith.constant 5 : index
    %c0_33 = arith.constant 0 : index
    %c0_34 = arith.constant 0 : index
    %48 = vector.load %arg3[%c5, %c0_33, %c0_34] : memref<9x1x256xf32, #tpu.memory_space<vmem>>, vector<1x1x256xf32>
    %49 = vector.shape_cast %48 : vector<1x1x256xf32> to vector<1x256xf32>
    %50 = vector.broadcast %49 : vector<1x256xf32> to vector<4x256xf32>
    %51 = arith.mulf %47, %50 : vector<4x256xf32>
    %c5_35 = arith.constant 5 : index
    %c0_36 = arith.constant 0 : index
    %c0_37 = arith.constant 0 : index
    %52 = vector.load %arg2[%c5_35, %c0_36, %c0_37] : memref<9x8x4xf32, #tpu.memory_space<vmem>>, vector<1x8x4xf32>
    %53 = vector.shape_cast %52 : vector<1x8x4xf32> to vector<8x4xf32>
    %cst_38 = arith.constant dense<0.000000e+00> : vector<8x256xf32>
    %54 = tpu.matmul %53, %51, %cst_38 {dimension_numbers = #tpu.dot_dimension_numbers<[1], [0], [0], [1], [0, 0, 1, 1], [], []>} : vector<8x4xf32>, vector<4x256xf32>, vector<8x256xf32> -> vector<8x256xf32>
    %55 = arith.addf %46, %54 : vector<8x256xf32>
    %c241_i32 = arith.constant 241 : i32
    %56 = tpu.dynamic_rotate %1 by %c241_i32 dim 1 : vector<4x256xf32>, i32 -> vector<4x256xf32>
    %c6 = arith.constant 6 : index
    %c0_39 = arith.constant 0 : index
    %c0_40 = arith.constant 0 : index
    %57 = vector.load %arg3[%c6, %c0_39, %c0_40] : memref<9x1x256xf32, #tpu.memory_space<vmem>>, vector<1x1x256xf32>
    %58 = vector.shape_cast %57 : vector<1x1x256xf32> to vector<1x256xf32>
    %59 = vector.broadcast %58 : vector<1x256xf32> to vector<4x256xf32>
    %60 = arith.mulf %56, %59 : vector<4x256xf32>
    %c6_41 = arith.constant 6 : index
    %c0_42 = arith.constant 0 : index
    %c0_43 = arith.constant 0 : index
    %61 = vector.load %arg2[%c6_41, %c0_42, %c0_43] : memref<9x8x4xf32, #tpu.memory_space<vmem>>, vector<1x8x4xf32>
    %62 = vector.shape_cast %61 : vector<1x8x4xf32> to vector<8x4xf32>
    %cst_44 = arith.constant dense<0.000000e+00> : vector<8x256xf32>
    %63 = tpu.matmul %62, %60, %cst_44 {dimension_numbers = #tpu.dot_dimension_numbers<[1], [0], [0], [1], [0, 0, 1, 1], [], []>} : vector<8x4xf32>, vector<4x256xf32>, vector<8x256xf32> -> vector<8x256xf32>
    %64 = arith.addf %55, %63 : vector<8x256xf32>
    %c240_i32 = arith.constant 240 : i32
    %65 = tpu.dynamic_rotate %1 by %c240_i32 dim 1 : vector<4x256xf32>, i32 -> vector<4x256xf32>
    %c7 = arith.constant 7 : index
    %c0_45 = arith.constant 0 : index
    %c0_46 = arith.constant 0 : index
    %66 = vector.load %arg3[%c7, %c0_45, %c0_46] : memref<9x1x256xf32, #tpu.memory_space<vmem>>, vector<1x1x256xf32>
    %67 = vector.shape_cast %66 : vector<1x1x256xf32> to vector<1x256xf32>
    %68 = vector.broadcast %67 : vector<1x256xf32> to vector<4x256xf32>
    %69 = arith.mulf %65, %68 : vector<4x256xf32>
    %c7_47 = arith.constant 7 : index
    %c0_48 = arith.constant 0 : index
    %c0_49 = arith.constant 0 : index
    %70 = vector.load %arg2[%c7_47, %c0_48, %c0_49] : memref<9x8x4xf32, #tpu.memory_space<vmem>>, vector<1x8x4xf32>
    %71 = vector.shape_cast %70 : vector<1x8x4xf32> to vector<8x4xf32>
    %cst_50 = arith.constant dense<0.000000e+00> : vector<8x256xf32>
    %72 = tpu.matmul %71, %69, %cst_50 {dimension_numbers = #tpu.dot_dimension_numbers<[1], [0], [0], [1], [0, 0, 1, 1], [], []>} : vector<8x4xf32>, vector<4x256xf32>, vector<8x256xf32> -> vector<8x256xf32>
    %73 = arith.addf %64, %72 : vector<8x256xf32>
    %c239_i32 = arith.constant 239 : i32
    %74 = tpu.dynamic_rotate %1 by %c239_i32 dim 1 : vector<4x256xf32>, i32 -> vector<4x256xf32>
    %c8 = arith.constant 8 : index
    %c0_51 = arith.constant 0 : index
    %c0_52 = arith.constant 0 : index
    %75 = vector.load %arg3[%c8, %c0_51, %c0_52] : memref<9x1x256xf32, #tpu.memory_space<vmem>>, vector<1x1x256xf32>
    %76 = vector.shape_cast %75 : vector<1x1x256xf32> to vector<1x256xf32>
    %77 = vector.broadcast %76 : vector<1x256xf32> to vector<4x256xf32>
    %78 = arith.mulf %74, %77 : vector<4x256xf32>
    %c8_53 = arith.constant 8 : index
    %c0_54 = arith.constant 0 : index
    %c0_55 = arith.constant 0 : index
    %79 = vector.load %arg2[%c8_53, %c0_54, %c0_55] : memref<9x8x4xf32, #tpu.memory_space<vmem>>, vector<1x8x4xf32>
    %80 = vector.shape_cast %79 : vector<1x8x4xf32> to vector<8x4xf32>
    %cst_56 = arith.constant dense<0.000000e+00> : vector<8x256xf32>
    %81 = tpu.matmul %80, %78, %cst_56 {dimension_numbers = #tpu.dot_dimension_numbers<[1], [0], [0], [1], [0, 0, 1, 1], [], []>} : vector<8x4xf32>, vector<4x256xf32>, vector<8x256xf32> -> vector<8x256xf32>
    %82 = arith.addf %73, %81 : vector<8x256xf32>
    %c0_57 = arith.constant 0 : index
    %c0_58 = arith.constant 0 : index
    %83 = vector.load %arg4[%c0_57, %c0_58] : memref<8x1xf32, #tpu.memory_space<vmem>>, vector<8x1xf32>
    %84 = vector.broadcast %83 : vector<8x1xf32> to vector<8x256xf32>
    %85 = arith.addf %82, %84 : vector<8x256xf32>
    %c0_59 = arith.constant 0 : index
    %c0_60 = arith.constant 0 : index
    %c0_61 = arith.constant 0 : index
    %86 = vector.load %arg5[%c0_59, %c0_60, %c0_61] : memref<1x8x256xf32, #tpu.memory_space<vmem>>, vector<1x8x256xf32>
    %87 = vector.shape_cast %86 : vector<1x8x256xf32> to vector<8x256xf32>
    %88 = vector.shape_cast %85 : vector<8x256xf32> to vector<1x8x256xf32>
    tpu.vector_store %arg5[%c0_59, %c0_60, %c0_61], %88 {strides = array<i32>} : memref<1x8x256xf32, #tpu.memory_space<vmem>>, vector<1x8x256xf32>,
    return
  }
  func.func @transform_0(%arg0: i32) -> (i32, i32, i32) {
    %c0_i32 = arith.constant 0 : i32
    %c0_i32_0 = arith.constant 0 : i32
    %c0_i32_1 = arith.constant 0 : i32
    return %arg0, %c0_i32, %c0_i32_0 : i32, i32, i32
  }
  func.func @transform_1(%arg0: i32) -> (i32, i32, i32) {
    %c0_i32 = arith.constant 0 : i32
    %c0_i32_0 = arith.constant 0 : i32
    %c0_i32_1 = arith.constant 0 : i32
    %c0_i32_2 = arith.constant 0 : i32
    return %c0_i32, %c0_i32_0, %c0_i32_1 : i32, i32, i32
  }
  func.func @transform_2(%arg0: i32) -> (i32, i32, i32) {
    %c0_i32 = arith.constant 0 : i32
    %c0_i32_0 = arith.constant 0 : i32
    %c0_i32_1 = arith.constant 0 : i32
    %c0_i32_2 = arith.constant 0 : i32
    return %c0_i32, %c0_i32_0, %c0_i32_1 : i32, i32, i32
  }
  func.func @transform_3(%arg0: i32) -> (i32, i32) {
    %c0_i32 = arith.constant 0 : i32
    %c0_i32_0 = arith.constant 0 : i32
    %c0_i32_1 = arith.constant 0 : i32
    return %c0_i32, %c0_i32_0 : i32, i32
  }
  func.func @transform_4(%arg0: i32) -> (i32, i32, i32) {
    %c0_i32 = arith.constant 0 : i32
    %c0_i32_0 = arith.constant 0 : i32
    %c0_i32_1 = arith.constant 0 : i32
    return %arg0, %c0_i32, %c0_i32_0 : i32, i32, i32
  }
}

</mosaic_0001>

<bundles_post_ra>
// kernel: tpu_custom_call.1
= control target key start
LH: loop header
LB: loop body
LE: loop exit
PB: predicated region body
PF: predicated region fallthrough
CT: control target
= control target key end

     0   :  { %9 = vsyncpa [#allocation3], 0  ;;  %s1347_s0 = inlined_call_operand.vmem [shape: f32[2,4,256], index: 0, kind: input, shape index: {}]   ;;  %s1348_s1 = inlined_call_operand.vmem [shape: f32[9,8,4], index: 1, kind: input, shape index: {}]   ;;  %s1349_s2 = inlined_call_operand.vmem [shape: f32[9,1,256], index: 2, kind: input, shape index: {}]   ;;  %s1350_s3 = inlined_call_operand.vmem [shape: f32[8,1], index: 3, kind: input, shape index: {}]   ;;  %s1351_s4 = inlined_call_operand.hbm [shape: f32[2,8,256], index: 4, kind: output, shape index: {}]  }
   0x1   :  { %11 = vsyncpa [#allocation3 + $0x1], 0  ;;  %s1152_s15 = smov 0   ;;  %s1154_s16 = smov 0  }
   0x2   :  { %s1156_s17 = smov 0   ;;  %s1158_s18 = smov 0  }
   0x3 LB: > { %s1173_s19 = sadd.s32 4294967295, %s1116_s18   ;;  %s938_s20 = sadd.s32 4294967294, %s1116_s18   ;;  %s1116_s18 = sphi %s1158_s18, %s1357_s18   ;;  %s1112_s17 = sphi %s1156_s17, %s1356_s17   ;;  %s1108_s16 = sphi %s1154_s16, %s1355_s16   ;;  %s1104_s15 = sphi %s1152_s15, %s1354_s15  }
   0x4   : > { %s1177_s21 = sadd.s32 1, %s1116_s18   ;;  %s113_s22 = sadd.s32 1, %s1112_s17 }
   0x5   : > { %s110_s23 = ssub.s32 %s1116_s18, %s1177_s21  ;;  %p123_p0 = scmp.ne.s32.totalorder %s1112_s17, %s1108_s16 }
   0x6   : > { %p111_p1 = scmp.eq.s32.totalorder %s110_s23, 0  ;;  %p124_p2 = scmp.eq.s32.totalorder %s1173_s19, 1 }
   0x7   : > { %p129_p3 = scmp.ne.s32.totalorder %s1108_s16, %s1104_s15  ;;  %p130_p4 = scmp.eq.s32.totalorder %s938_s20, 1 }
   0x8   : > { %s1188_s24 = scalar_select %p111_p1, %s1112_s17, %s113_s22  }
   0x9   : > { %p1190_p5 = por %p124_p2, %p123_p0  ;;  %p1194_p6 = por %p130_p4, %p129_p3 }
   0xa   : > { %p941_p7 = scmp.ge.s32.totalorder %s1116_s18, 1  ;;  %p165_p8 = scmp.lt.s32.totalorder %s1116_s18, 3 }
   0xc   : > { %p166_p9 = pnand %p941_p7, %p165_p8 }
   0xd   : > { %p191_p10 = scmp.lt.s32.totalorder (!%p166_p9), %s1173_s19, 1  ;;  %s1118_s6 = smov (!%p166_p9), 17  }
   0xe   : > { %169 = sbr.rel (%p166_p9) target bundleno = 349 (0x15d), region = 36  ;;  %s1119_s9 = smov (!%p166_p9), 16  }
   0xf   : > { %s1120_s10 = smov (!%p166_p9), 15   ;;  %s1121_s11 = smov (!%p166_p9), 1  }
  0x10   : > { %s1122_s12 = smov (!%p166_p9), 127   ;;  %s1123_s13 = smov (!%p166_p9), 113  }
  0x11   : > { %s1124_s14 = smov (!%p166_p9), 112   ;;  %s1125_s20 = smov (!%p166_p9), 111  }
  0x12   : > { %s1003_s29 = sshll.u32 (!%p166_p9), %s1173_s19, 4 }
  0x13   : > { %s192_s27 = scalar_select %p191_p10, %s1173_s19, 1  ;;  %v967_v3 = vld [vmem:[%s1349_s2 + $0x8] sm:$0x3]  ;;  %vm248_vm0 = vcmask 1043456   ;;  %v207_v25 = vlaneseq  ;;  %v212_v29 = vld [vmem:[%s1349_s2] sm:$0x3] }
  0x14   : > { %v496_v6 = vperm.slane %v967_v3, 1  ;;  %v495_v7 = vperm.slane %v967_v3, 0  ;;  %v214_v30 = vperm.slane %v212_v29, 0  ;;  %v215_v31 = vperm.slane %v212_v29, 1  ;;  %v220_v38 = vld [vmem:[%s1348_s1] sm:$0xff]  ;;  %v946_v53 = vld [vmem:[%s1348_s1 + $0x8] sm:$0xff] }
  0x15   : > { %s1002_s28 = sshll.u32 %s192_s27, 3  ;;  %v1213_v27 = vand.u32 127, %v207_v25  ;;  %vm244_vm2 = vcmask 31744   ;;  %v945_v39 = vld [vmem:[%s1349_s2 + $0x2] sm:$0x3]  ;;  %v980_v25 = vld [vmem:[%s1348_s1 + $0x30] sm:$0xff] }
  0x16   : > { %s195_s5 = scalar_lea.vmem %s1347_s0, %s1002_s28  ;;  %v497_v8 = vrot.slane %v496_v6, 4  ;;  %v955_v40 = vld [vmem:[%s1349_s2 + $0x4] sm:$0x3]  ;;  %v236_v42 = vperm.slane %v945_v39, 0  ;;  %v237_v43 = vperm.slane %v945_v39, 1  ;;  %s188_s27 = sand.u32 1, %s1108_s16  }
  0x17   : > { %v196_v0 = vld [vmem:[%s195_s5] sm:$0xff]  ;;  %vm209_vm1 = vcmp.lt.s32.totalorder %v1213_v27, 17  ;;  %vm353_vm3 = vcmp.lt.s32.totalorder %v1213_v27, 15  ;;  %vm230_vm4 = vcmp.lt.s32.totalorder %v1213_v27, 16  ;;  %v359_v44 = vperm.slane %v955_v40, 0  ;;  %s942_s28 = sshll.u32 %s188_s27, 4 }
  0x18   : > { %198 = vst [vmem:[#allocation1] ss:$2 sm:$0xff] %v196_v0  ;;  %v498_v11 = vsel %vm248_vm0, %v495_v7, %v497_v8  ;;  %v360_v45 = vperm.slane %v955_v40, 1  ;;  %v961_v56 = vld [vmem:[%s1349_s2 + $0x6] sm:$0x3]  ;;  %vm427_vm5 = vcmp.lt.s32.totalorder %v1213_v27, 1 }
  0x19   : > { %v500_v12 = vmul.f32 %v498_v11, %v196_v0  ;;  %v433_v57 = vperm.slane %v961_v56, 0  ;;  %v434_v58 = vperm.slane %v961_v56, 1  ;;  %v968_v3 = vld [vmem:[%s1348_s1 + $0x20] sm:$0xff]  ;;  %vm565_vm6 = vcmp.lt.s32.totalorder %v1213_v27, 127  ;;  %s190_s7 = scalar_lea.vmem [#allocation2], %s942_s28  ;;  %s863_s19 = scalar_lea.sflag [#allocation3], %s188_s27 }
  0x1a   : > { %v852_v6 = vld [vmem:[%s1350_s3] sm:$0xff]  ;;  %vm639_vm7 = vcmp.lt.s32.totalorder %v1213_v27, 113  ;;  %vm713_vm8 = vcmp.lt.s32.totalorder %v1213_v27, 112  ;;  %vm787_vm9 = vcmp.lt.s32.totalorder %v1213_v27, 111  ;;  %s876_s8 = sshll.u32 %s190_s7, 4  ;;  %s877_s8 = int_to_ptr.vmem [resolvable:$true] %s876_s8 }
  0x1f   : > { %v199_v1 = vld.sshfl [vmem:[#allocation1] sm:$0xff pattern:$0x75316420]  ;;  %v200_v2 = vld.sshfl [vmem:[#allocation1 + $0x8] sm:$0xff pattern:$0x75316420] }
  0x20   : > { %203 = vrot.lane.b32.xlu0 %v199_v1, %s1118_s6  ;;  %221 = vst [vmem:[#allocation1] ss:$2 sm:$0xff] %v196_v0  ;;  %v956_v1 = vld [vmem:[%s1348_s1 + $0x10] sm:$0xff] }
  0x27   : > { %v222_v4 = vld.sshfl [vmem:[#allocation1] sm:$0xff pattern:$0x75316420]  ;;  %v223_v5 = vld.sshfl [vmem:[#allocation1 + $0x8] sm:$0xff pattern:$0x75316420] }
  0x28   : > { %226 = vrot.lane.b32.xlu1 %v222_v4, %s1119_s9  ;;  %205 = vrot.lane.b32.xlu0 %v200_v2, %s1118_s6  ;;  %344 = vst [vmem:[#allocation1] ss:$2 sm:$0xff] %v196_v0  ;;  %v962_v2 = vld [vmem:[%s1348_s1 + $0x18] sm:$0xff]  ;;  %v973_v4 = vld [vmem:[%s1349_s2 + $0xa] sm:$0x3]  ;;  %s874_s6 = scalar_lea.hbm %s1351_s4, %s1003_s29 }
  0x29   : > { %v571_v7 = vperm.slane %v973_v4, 0  ;;  %v572_v8 = vperm.slane %v973_v4, 1 }
  0x2f   : > { %v345_v9 = vld.sshfl [vmem:[#allocation1] sm:$0xff pattern:$0x75316420]  ;;  %v346_v10 = vld.sshfl [vmem:[#allocation1 + $0x8] sm:$0xff pattern:$0x75316420] }
  0x30   : > { %228 = vrot.lane.b32.xlu1 %v223_v5, %s1119_s9  ;;  %418 = vst [vmem:[#allocation1] ss:$2 sm:$0xff] %v196_v0  ;;  %349 = vrot.lane.b32.xlu2 %v345_v9, %s1120_s10  ;;  %v1126_v9 = vmov 0   ;;  %s878_s9 = sshll.u32 %s874_s6, 4  ;;  %s879_s9 = int_to_ptr.hbm [resolvable:$true] %s878_s9 }
  0x31   : > { %1052 = vset.pattern.permute.xlu1 %v1126_v9  ;;  %1053 = vset.pattern.permute.xlu0 %v1126_v9 }
  0x37   : > { %v420_v13 = vld.sshfl [vmem:[#allocation1 + $0x8] sm:$0xff pattern:$0x75316420]  ;;  %v419_v14 = vld.sshfl [vmem:[#allocation1] sm:$0xff pattern:$0x75316420] }
  0x38   : > { %425 = vrot.lane.b32.xlu1 %v420_v13, %s1121_s11  ;;  %423 = vrot.lane.b32.xlu0 %v419_v14, %s1121_s11  ;;  %504 = vst [vmem:[#allocation1] ss:$2 sm:$0xff] %v500_v12 }
  0x39   : > { %351 = vrot.lane.b32.xlu2 %v346_v10, %s1120_s10  ;;  %s1068_s10 = sshra.s32 %s879_s9, 4  ;;  %s1069_s10 = int_to_ptr.hbm [resolvable:$true] %s1068_s10 }
  0x3a   : > { %s1070_s11 = scalar_lea.hbm %s1069_s10, 16  ;;  %p1075_p0 = scmp.lt.s32.totalorder %s1069_s10, %s1351_s4 }
  0x3b   : > { %p1071_p11 = scmp.ne.s32.totalorder %s1069_s10, %s1070_s11 }
  0x3d   : > { %p1072_p12 = pnand %p1071_p11, %p1190_p5 }
  0x3f   : > { %v1209_v15 = vld.sshfl [vmem:[#allocation1] sm:$0xff pattern:$0x75316420]  ;;  %v1211_v16 = vld.sshfl [vmem:[#allocation1 + $0x8] sm:$0xff pattern:$0x75316420]  ;;  %p1073_p13 = pneg %p1072_p12 }
  0x40   : > { %556 = vst [vmem:[#allocation1] ss:$2 sm:$0xff] %v196_v0 }
  0x47   : > { %v558_v17 = vld.sshfl [vmem:[#allocation1 + $0x8] sm:$0xff pattern:$0x75316420]  ;;  %v557_v18 = vld.sshfl [vmem:[#allocation1] sm:$0xff pattern:$0x75316420] }
  0x48   : > { %563 = vrot.lane.b32.xlu0 %v558_v17, %s1122_s12  ;;  %630 = vst [vmem:[#allocation1] ss:$2 sm:$0xff] %v196_v0  ;;  %561 = vrot.lane.b32.xlu2 %v557_v18, %s1122_s12 }
  0x4f   : > { %v631_v19 = vld.sshfl [vmem:[#allocation1] sm:$0xff pattern:$0x75316420]  ;;  %v632_v20 = vld.sshfl [vmem:[#allocation1 + $0x8] sm:$0xff pattern:$0x75316420] }
  0x50   : > { %635 = vrot.lane.b32.xlu1 %v631_v19, %s1123_s13  ;;  %704 = vst [vmem:[#allocation1] ss:$2 sm:$0xff] %v196_v0  ;;  %637 = vrot.lane.b32.xlu2 %v632_v20, %s1123_s13 }
  0x57   : > { %v706_v21 = vld.sshfl [vmem:[#allocation1 + $0x8] sm:$0xff pattern:$0x75316420]  ;;  %v705_v22 = vld.sshfl [vmem:[#allocation1] sm:$0xff pattern:$0x75316420] }
  0x58   : > { %711 = vrot.lane.b32.xlu1 %v706_v21, %s1124_s14  ;;  %709 = vrot.lane.b32.xlu0 %v705_v22, %s1124_s14  ;;  %778 = vst [vmem:[#allocation1] ss:$2 sm:$0xff] %v196_v0  ;;  %s1074_s14 = scalar_lea.hbm %s1351_s4, 32 }
  0x59   : > { %p1076_p1 = scmp.lt.s32.totalorder %s1074_s14, %s1070_s11 }
  0x5b   : > { %p1077_p2 = por %p1076_p1, %p1075_p0 }
  0x5d   : > { %p1078_p3 = pnand %p1077_p2, %p1073_p13 }
  0x5f   : > { %v780_v23 = vld.sshfl [vmem:[#allocation1 + $0x8] sm:$0xff pattern:$0x75316420]  ;;  %v779_v24 = vld.sshfl [vmem:[#allocation1] sm:$0xff pattern:$0x75316420] }
  0x60   : > { %785 = vrot.lane.b32.xlu0 %v780_v23, %s1125_s20  ;;  %783 = vrot.lane.b32.xlu2 %v779_v24, %s1125_s20 }
  0x61   : > { %855 = vperm.xlu1 %1052, %v852_v6  }
  0x8a   : > { %v350_v28 = vpop.permute.xlu2 %349 }
  0x92   : > { %v204_v26 = vpop.permute.xlu0 %203 }
  0x93   : > { %v352_v41 = vpop.permute.xlu2 %351 }
  0x94   : > { %v354_v46 = vsel %vm353_vm3, %v350_v28, %v352_v41  ;;  %v355_v47 = vsel %vm353_vm3, %v352_v41, %v350_v28 }
  0x95   : > { %v363_v54 = vmul.f32 %v359_v44, %v355_v47  ;;  %v364_v55 = vmul.f32 %v360_v45, %v354_v46  ;;  %v992_v46 = vld [vmem:[%s1348_s1 + $0x40] sm:$0xff] }
  0x9a   : > { %v227_v32 = vpop.permute.xlu1 %226  ;;  %v206_v33 = vpop.permute.xlu0 %205 }
  0x9b   : > { %v210_v34 = vsel %vm209_vm1, %v204_v26, %v206_v33  ;;  %v211_v35 = vsel %vm209_vm1, %v206_v33, %v204_v26  ;;  %v985_v26 = vld [vmem:[%s1349_s2 + $0xe] sm:$0x3] }
  0x9c   : > { %v218_v36 = vmul.f32 %v214_v30, %v211_v35  ;;  %v219_v37 = vmul.f32 %v215_v31, %v210_v34  ;;  %v719_v28 = vperm.slane %v985_v26, 0  ;;  %v720_v29 = vperm.slane %v985_v26, 1 }
  0x9e   : > { %951 = vmatpush.msk.msra.mxu2 %vm248_vm0, %v218_v36  ;;  %953 = vmatpush.msk.msra.mxu3 %vm248_vm0, %v219_v37  ;;  %v986_v36 = vld [vmem:[%s1348_s1 + $0x38] sm:$0xff]  ;;  %v991_v37 = vld [vmem:[%s1349_s2 + $0x10] sm:$0x3] }
  0x9f   : > { %952 = vmatmul.msk.f32.vlgmr.msra.gmra.mxu2 %vm244_vm2, %v220_v38  ;;  %954 = vmatmul.msk.f32.vlgmr.msra.gmra.mxu3 %vm244_vm2, %v220_v38  ;;  %v793_v38 = vperm.slane %v991_v37, 0  ;;  %v794_v39 = vperm.slane %v991_v37, 1 }
  0xa2   : > { %v229_v48 = vpop.permute.xlu1 %228  ;;  %v562_v5 = vpop.permute.xlu2 %561 }
  0xa3   : > { %v231_v49 = vsel %vm230_vm4, %v227_v32, %v229_v48  ;;  %v232_v50 = vsel %vm230_vm4, %v229_v48, %v227_v32 }
  0xa4   : > { %v240_v51 = vmul.f32 %v236_v42, %v232_v50  ;;  %v241_v52 = vmul.f32 %v237_v43, %v231_v49 }
  0xa6   : > { %947 = vmatpush.msk.msra.mxu0 %vm248_vm0, %v240_v51  ;;  %949 = vmatpush.msk.msra.mxu1 %vm248_vm0, %v241_v52 }
  0xa7   : > { %948 = vmatmul.msk.f32.vlgmr.msra.gmra.mxu0 %vm244_vm2, %v946_v53  ;;  %950 = vmatmul.msk.f32.vlgmr.msra.gmra.mxu1 %vm244_vm2, %v946_v53 }
  0xa8   : > { %957 = vmatpush.msk.msrb.mxu0 %vm248_vm0, %v363_v54  ;;  %959 = vmatpush.msk.msrb.mxu1 %vm248_vm0, %v364_v55 }
  0xaa   : > { %969 = vmatpush.msk.msra.mxu0 %vm248_vm0, %v1209_v15  ;;  %971 = vmatpush.msk.msra.mxu1 %vm248_vm0, %v1211_v16  ;;  %v426_v59 = vpop.permute.xlu1 %425  ;;  %v424_v60 = vpop.permute.xlu0 %423  ;;  %v974_v15 = vld [vmem:[%s1348_s1 + $0x28] sm:$0xff] }
  0xab   : > { %v428_v61 = vsel %vm427_vm5, %v424_v60, %v426_v59  ;;  %v429_v62 = vsel %vm427_vm5, %v426_v59, %v424_v60  ;;  %v979_v16 = vld [vmem:[%s1349_s2 + $0xc] sm:$0x3]  ;;  %v638_v17 = vpop.permute.xlu2 %637 }
  0xac   : > { %v437_v63 = vmul.f32 %v433_v57, %v429_v62  ;;  %v438_v0 = vmul.f32 %v434_v58, %v428_v61  ;;  %v645_v18 = vperm.slane %v979_v16, 0  ;;  %v646_v19 = vperm.slane %v979_v16, 1 }
  0xae   : > { %963 = vmatpush.msk.msrb.mxu2 %vm248_vm0, %v437_v63  ;;  %965 = vmatpush.msk.msrb.mxu3 %vm248_vm0, %v438_v0 }
  0xaf   : > { %958 = vmatmul.msk.f32.vlgmr.msrb.gmra.mxu0 %vm244_vm2, %v956_v1  ;;  %960 = vmatmul.msk.f32.vlgmr.msrb.gmra.mxu1 %vm244_vm2, %v956_v1 }
  0xb0   : > { %964 = vmatmul.msk.f32.vlgmr.msrb.gmra.mxu2 %vm244_vm2, %v962_v2  ;;  %966 = vmatmul.msk.f32.vlgmr.msrb.gmra.mxu3 %vm244_vm2, %v962_v2 }
  0xb7   : > { %970 = vmatmul.msk.f32.vlgmr.msra.gmra.mxu0 %vm244_vm2, %v968_v3  ;;  %972 = vmatmul.msk.f32.vlgmr.msra.gmra.mxu1 %vm244_vm2, %v968_v3 }
  0xba   : > { %v564_v10 = vpop.permute.xlu0 %563  ;;  %v784_v40 = vpop.permute.xlu2 %783 }
  0xbb   : > { %v566_v11 = vsel %vm565_vm6, %v562_v5, %v564_v10  ;;  %v567_v12 = vsel %vm565_vm6, %v564_v10, %v562_v5 }
  0xbc   : > { %v575_v13 = vmul.f32 %v571_v7, %v566_v11  ;;  %v576_v14 = vmul.f32 %v572_v8, %v567_v12 }
  0xbe   : > { %975 = vmatpush.msk.msra.mxu2 %vm248_vm0, %v575_v13  ;;  %977 = vmatpush.msk.msra.mxu3 %vm248_vm0, %v576_v14 }
  0xbf   : > { %976 = vmatmul.msk.f32.vlgmr.msra.gmra.mxu2 %vm244_vm2, %v974_v15  ;;  %978 = vmatmul.msk.f32.vlgmr.msra.gmra.mxu3 %vm244_vm2, %v974_v15 }
  0xc2   : > { %v636_v20 = vpop.permute.xlu1 %635 }
  0xc3   : > { %v640_v21 = vsel %vm639_vm7, %v636_v20, %v638_v17  ;;  %v641_v22 = vsel %vm639_vm7, %v638_v17, %v636_v20 }
  0xc4   : > { %v649_v23 = vmul.f32 %v645_v18, %v640_v21  ;;  %v650_v24 = vmul.f32 %v646_v19, %v641_v22 }
  0xc6   : > { %981 = vmatpush.msk.msrb.mxu0 %vm248_vm0, %v649_v23  ;;  %983 = vmatpush.msk.msrb.mxu1 %vm248_vm0, %v650_v24 }
  0xc7   : > { %982 = vmatmul.msk.f32.vlgmr.msrb.gmra.mxu0 %vm244_vm2, %v980_v25  ;;  %984 = vmatmul.msk.f32.vlgmr.msrb.gmra.mxu1 %vm244_vm2, %v980_v25 }
  0xca   : > { %v712_v30 = vpop.permute.xlu1 %711  ;;  %v710_v31 = vpop.permute.xlu0 %709 }
  0xcb   : > { %v714_v32 = vsel %vm713_vm8, %v710_v31, %v712_v30  ;;  %v715_v33 = vsel %vm713_vm8, %v712_v30, %v710_v31 }
  0xcc   : > { %v723_v34 = vmul.f32 %v719_v28, %v714_v32  ;;  %v724_v35 = vmul.f32 %v720_v29, %v715_v33 }
  0xce   : > { %987 = vmatpush.msk.msrb.mxu2 %vm248_vm0, %v723_v34  ;;  %989 = vmatpush.msk.msrb.mxu3 %vm248_vm0, %v724_v35 }
  0xcf   : > { %988 = vmatmul.msk.f32.vlgmr.msrb.gmra.mxu2 %vm244_vm2, %v986_v36  ;;  %990 = vmatmul.msk.f32.vlgmr.msrb.gmra.mxu3 %vm244_vm2, %v986_v36 }
  0xd2   : > { %v786_v41 = vpop.permute.xlu0 %785 }
  0xd3   : > { %v788_v42 = vsel %vm787_vm9, %v784_v40, %v786_v41  ;;  %v789_v43 = vsel %vm787_vm9, %v786_v41, %v784_v40  ;;  %v856_v12 = vpop.permute.xlu1 %855 }
  0xd4   : > { %v797_v44 = vmul.f32 %v793_v38, %v788_v42  ;;  %v798_v45 = vmul.f32 %v794_v39, %v789_v43 }
  0xd6   : > { %993 = vmatpush.msk.msra.mxu0 %vm248_vm0, %v797_v44  ;;  %995 = vmatpush.msk.msra.mxu1 %vm248_vm0, %v798_v45 }
  0xd7   : > { %994 = vmatmul.msk.f32.vlgmr.msra.gmra.mxu0 %vm244_vm2, %v992_v46  ;;  %996 = vmatmul.msk.f32.vlgmr.msra.gmra.mxu1 %vm244_vm2, %v992_v46 }
 0x122   : > { %v321_v48 = vpop.f32.mrf.mxu2  ;;  %v341_v49 = vpop.f32.mrf.mxu3 }
 0x124   : > { %v272_v27 = vpop.f32.mrf.mxu0  ;;  %v292_v47 = vpop.f32.mrf.mxu1 }
 0x125   : > { %v322_v52 = vadd.f32 %v321_v48, %v272_v27  ;;  %v342_v53 = vadd.f32 %v341_v49, %v292_v47 }
 0x12c   : > { %v393_v50 = vpop.f32.mrf.mxu0  ;;  %v413_v51 = vpop.f32.mrf.mxu1 }
 0x12d   : > { %v416_v56 = vadd.f32 %v393_v50, %v322_v52  ;;  %v417_v57 = vadd.f32 %v413_v51, %v342_v53 }
 0x133   : > { %v467_v54 = vpop.f32.mrf.mxu2  ;;  %v487_v55 = vpop.f32.mrf.mxu3 }
 0x134   : > { %v531_v58 = vpop.f32.mrf.mxu0  ;;  %v551_v59 = vpop.f32.mrf.mxu1  ;;  %v490_v60 = vadd.f32 %v467_v54, %v416_v56  ;;  %v491_v61 = vadd.f32 %v487_v55, %v417_v57 }
 0x136   : > { %v554_v0 = vadd.f32 %v531_v58, %v490_v60  ;;  %v555_v1 = vadd.f32 %v551_v59, %v491_v61 }
 0x142   : > { %v605_v62 = vpop.f32.mrf.mxu2  ;;  %v625_v63 = vpop.f32.mrf.mxu3 }
 0x143   : > { %v628_v4 = vadd.f32 %v605_v62, %v554_v0  ;;  %v629_v5 = vadd.f32 %v625_v63, %v555_v1 }
 0x144   : > { %v679_v2 = vpop.f32.mrf.mxu0  ;;  %v699_v3 = vpop.f32.mrf.mxu1 }
 0x145   : > { %v702_v6 = vadd.f32 %v679_v2, %v628_v4  ;;  %v703_v7 = vadd.f32 %v699_v3, %v629_v5 }
 0x152   : > { %v753_v8 = vpop.f32.mrf.mxu2  ;;  %v773_v9 = vpop.f32.mrf.mxu3 }
 0x153   : > { %v776_v10 = vadd.f32 %v753_v8, %v702_v6  ;;  %v777_v11 = vadd.f32 %v773_v9, %v703_v7 }
 0x154   : > { %v827_v13 = vpop.f32.mrf.mxu0  ;;  %v847_v14 = vpop.f32.mrf.mxu1 }
 0x155   : > { %v850_v15 = vadd.f32 %v827_v13, %v776_v10  ;;  %v851_v16 = vadd.f32 %v847_v14, %v777_v11 }
 0x157   : > { %v858_v17 = vadd.f32 %v856_v12, %v850_v15  ;;  %v859_v18 = vadd.f32 %v856_v12, %v851_v16 }
 0x159   : > { %860 = vst [vmem:[%s190_s7] sm:$0xff] %v858_v17 }
 0x15a   : > { %861 = vst [vmem:[%s190_s7 + $0x8] sm:$0xff] %v859_v18 }
 0x15b   : > { %1081 = shalt.err (!%p1078_p3)
}
 0x15c   : > { %1004 = dma.vmem_to_hbm [thread:$0]  (%p1190_p5), %s877_s8, 256, %s879_s9, %s863_s19  }
 0x15d PF: > { %p1010_p4 = scmp.ge.s32.totalorder %s1116_s18, 2  ;;  %s890_s23 = sand.u32 1, %s1104_s15  }
 0x15e   : > { %s891_s27 = scalar_lea.sflag [#allocation3], %s890_s23 }
 0x15f   : > { %p1007_p7 = pnand %p1010_p4, %p1194_p6 }
 0x161   : > { %p1008_p8 = pneg %p1007_p7 }
 0x163   : > { %1099 = dma.done.wait (%p1008_p8), %s891_s27, 256  }
 0x164   : > { %1101 = vsyncadd (%p1008_p8), %s891_s27, 4294967040  ;;  %p14_p9 = scmp.ge.s32.totalorder %s1177_s21, 4   ;;  %s1354_s15 = smov %s1108_s16 }
 0x165   : > { %s1355_s16 = smov %s1112_s17  ;;  %s1356_s17 = smov %s1188_s24 }
 0x166   : > { %s1357_s18 = smov %s1177_s21  ;;  %16 = sbr.rel (!%p14_p9) target bundleno = 3 (0x3), region = 87 }
 0x16b   :  { %897 = vsyncpa [#allocation3], 1 }
 0x16c   :  { %899 = vsyncpa [#allocation3 + $0x1], 1 }

</bundles_post_ra>
